<compile_context>
chip_gen: v7x
topology: tpu7x:2x2x1
jax: 0.10.0
libtpu: 0.0.40
codegen_flags: <defaults>
</compile_context>

<pallas_src>
import jax
import jax.numpy as jnp
from jax.experimental import pallas as pl
from jax.experimental.pallas import tpu as pltpu

BN_EPS = 1e-5  # torch.nn.BatchNorm1d default eps


# --------------------------------------------------------------------------- #
# Kernel: one batch tile per grid step, weights VMEM-resident.
# Layout: features on sublanes, batch on lanes.
# --------------------------------------------------------------------------- #
def _mlp_kernel(x_ref, w1_ref, b1_ref, w2_ref, b2_ref, w3_ref, b3_ref, o_ref):
    # Layer 1: (300, 55) @ (55, tb) -> (300, tb); f32 accumulation; bias; ReLU.
    h1 = jnp.dot(w1_ref[...], x_ref[...], preferred_element_type=jnp.float32)
    h1 = jnp.maximum(h1 + b1_ref[...], 0.0)
    # BatchNorm1 (post-ReLU) is folded into w2/b2; Dropout(p=0.4) is identity
    # in eval mode.

    # Layer 2: (100, 300) @ (300, tb) -> (100, tb); bias; ReLU.
    h2 = jnp.dot(w2_ref[...], h1.astype(w2_ref.dtype),
                 preferred_element_type=jnp.float32)
    h2 = jnp.maximum(h2 + b2_ref[...], 0.0)
    # BatchNorm2 (post-ReLU) is folded into w3/b3.

    # Layer 3: (1, 100) @ (100, tb) -> (1, tb); bias; sigmoid.  Output block is
    # lane-dense (full tb lanes), so the store is an unmasked vst.
    z = jnp.dot(w3_ref[...], h2.astype(w3_ref.dtype),
                preferred_element_type=jnp.float32) + b3_ref[...]
    o_ref[...] = (1.0 / (1.0 + jnp.exp(-z))).astype(o_ref.dtype)


# --------------------------------------------------------------------------- #
# Wrapper-level parameter preparation (exact eval-mode BN folding + transpose).
# --------------------------------------------------------------------------- #
def _round_up(n, m):
    return ((n + m - 1) // m) * m


def _bn_affine(gamma, beta, mean, var):
    """Eval-mode BatchNorm1d as y -> y * s + t."""
    s = gamma * jax.lax.rsqrt(var + BN_EPS)   # (1, F)
    t = beta - mean * s                       # (1, F)
    return s, t


def _prepare_kernel_params(p, compute_dtype):
    """Fold the post-ReLU BatchNorms into the FOLLOWING Linear layers and
    transpose everything for the batch-on-lanes dataflow.

      ReLU(y) * s + t  feeding  Linear(w, b)
        ==  ReLU(y) @ (s^T * w) + (t @ w + b)      (exact, any sign of s)
    """
    s1, t1 = _bn_affine(p["g1"], p["be1"], p["m1"], p["v1"])
    s2, t2 = _bn_affine(p["g2"], p["be2"], p["m2"], p["v2"])

    w2f = p["w2"] * s1.T                # (300, 100)
    b2f = t1 @ p["w2"] + p["b2"]        # (1, 100)
    w3f = p["w3"] * s2.T                # (100, 1)
    b3f = t2 @ p["w3"] + p["b3"]        # (1, 1)

    w1T = p["w1"].T.astype(compute_dtype)   # (300, 55)
    w2T = w2f.T.astype(compute_dtype)       # (100, 300)
    w3T = w3f.T.astype(compute_dtype)       # (1, 100)
    b1T = p["b1"].T.astype(jnp.float32)     # (300, 1)  biases stay f32
    b2T = b2f.T.astype(jnp.float32)         # (100, 1)
    b3T = b3f.T.astype(jnp.float32)         # (1, 1)
    return w1T, b1T, w2T, b2T, w3T, b3T


def _choose_tiles(B, tb):
    """Pick (tile, padded_B, num_tiles).  tile is a 128-lane multiple, the pad
    is at most ~one 128-lane block, and num_tiles >= 2 for B >= 256 so v7x's
    two TensorCores both get work on the 'parallel' batch axis."""
    b128 = _round_up(B, 128)
    n = pl.cdiv(b128, tb)
    if n == 1 and b128 >= 256:
        n = 2
    tile = _round_up(pl.cdiv(b128, n), 128)
    return tile, tile * n, n


# --------------------------------------------------------------------------- #
# Public forward.
# --------------------------------------------------------------------------- #
def mlp_forward(x, params, *, tb=2048, use_bf16=True):
    """x: (B, 55) float32.  Returns (B, 1) float32 (eval-mode forward)."""
    B, F = x.shape
    cdt = jnp.bfloat16 if use_bf16 else jnp.float32
    w1T, b1T, w2T, b2T, w3T, b3T = _prepare_kernel_params(params, cdt)

    tb_eff, Bp, n_tiles = _choose_tiles(B, tb)

    # Transpose so the batch rides the lane axis; the small zero-pad of the
    # ragged tail fuses into this same copy under jit.
    xT = jnp.pad(x, ((0, Bp - B), (0, 0))).T.astype(cdt)     # (55, Bp)

    const = lambda i: (0, 0)  # weights/biases: same (only) block every step
    out = pl.pallas_call(
        _mlp_kernel,
        out_shape=jax.ShapeDtypeStruct((1, Bp), jnp.float32),
        grid=(n_tiles,),
        in_specs=[
            pl.BlockSpec((F, tb_eff), lambda i: (0, i)),     # streamed xT tile
            pl.BlockSpec(w1T.shape, const),
            pl.BlockSpec(b1T.shape, const),
            pl.BlockSpec(w2T.shape, const),
            pl.BlockSpec(b2T.shape, const),
            pl.BlockSpec(w3T.shape, const),
            pl.BlockSpec(b3T.shape, const),
        ],
        out_specs=pl.BlockSpec((1, tb_eff), lambda i: (0, i)),
        compiler_params=pltpu.CompilerParams(
            dimension_semantics=("parallel",)),
    )(xT, w1T, b1T, w2T, b2T, w3T, b3T)

    # (1, Bp) -> (Bp, 1) is a free contiguous reshape; drop the padded tail.
    return out.reshape(Bp, 1)[:B]


# --------------------------------------------------------------------------- #
# Deterministic synthetic parameters (non-identity BN stats, incl. negative
# gammas, so the BN-through-ReLU fold is actually exercised) and a pure-JAX
# eval-mode reference matching the PyTorch module.
# --------------------------------------------------------------------------- #
def init_params(key):
    ks = jax.random.split(key, 16)

    def linear(kw, kb, fan_in, fan_out):
        bound = 1.0 / jnp.sqrt(float(fan_in))
        w = jax.random.uniform(kw, (fan_in, fan_out), jnp.float32, -bound, bound)
        b = jax.random.uniform(kb, (1, fan_out), jnp.float32, -bound, bound)
        return w, b

    def bn(kg, ksgn, kb, km, kv, f):
        sign = jnp.where(jax.random.bernoulli(ksgn, 0.25, (1, f)), -1.0, 1.0)
        g = jax.random.uniform(kg, (1, f), jnp.float32, 0.5, 1.5) * sign
        be = 0.1 * jax.random.normal(kb, (1, f), jnp.float32)
        m = 0.2 * jax.random.normal(km, (1, f), jnp.float32)
        v = jax.random.uniform(kv, (1, f), jnp.float32, 0.5, 2.0)
        return g, be, m, v

    w1, b1 = linear(ks[0], ks[1], 55, 300)
    w2, b2 = linear(ks[2], ks[3], 300, 100)
    w3, b3 = linear(ks[4], ks[5], 100, 1)
    g1, be1, m1, v1 = bn(ks[6], ks[7], ks[8], ks[9], ks[10], 300)
    g2, be2, m2, v2 = bn(ks[11], ks[12], ks[13], ks[14], ks[15], 100)

    return dict(w1=w1, b1=b1, g1=g1, be1=be1, m1=m1, v1=v1,
                w2=w2, b2=b2, g2=g2, be2=be2, m2=m2, v2=v2,
                w3=w3, b3=b3)


def mlp_ref(x, p):
    """Pure-JAX eval-mode reference: Linear->ReLU->BN->(Dropout)->Linear->ReLU->BN->Linear->Sigmoid."""
    h = jnp.maximum(x @ p["w1"] + p["b1"], 0.0)
    h = (h - p["m1"]) * jax.lax.rsqrt(p["v1"] + BN_EPS) * p["g1"] + p["be1"]
    h = jnp.maximum(h @ p["w2"] + p["b2"], 0.0)
    h = (h - p["m2"]) * jax.lax.rsqrt(p["v2"] + BN_EPS) * p["g2"] + p["be2"]
    return 1.0 / (1.0 + jnp.exp(-(h @ p["w3"] + p["b3"])))


if __name__ == "__main__":
    key = jax.random.PRNGKey(0)
    k_x, k_p = jax.random.split(key)
    params = init_params(k_p)

    fwd = jax.jit(mlp_forward, static_argnames=("tb", "use_bf16"))

    # 1) Small batch, pure-f32 path: single grid step, tight check vs reference
    #    (non-identity BN stats exercise the corrected BN fold).
    B = 8
    x = jax.random.normal(k_x, (B, 55), jnp.float32)
    out = jax.block_until_ready(fwd(x, params, tb=2048, use_bf16=False))
    ref = mlp_ref(x, params)
    assert out.shape == (B, 1), out.shape
    assert jnp.allclose(out, ref, atol=1e-4, rtol=1e-4), \
        float(jnp.max(jnp.abs(out - ref)))

    # 2) Ragged batch (not a multiple of 128): exercises zero-padding and a
    #    2-step "parallel" grid (both v7x TensorCores), still f32.
    B2 = 300
    x2 = jax.random.normal(k_x, (B2, 55), jnp.float32)
    out2 = jax.block_until_ready(fwd(x2, params, tb=2048, use_bf16=False))
    ref2 = mlp_ref(x2, params)
    assert out2.shape == (B2, 1), out2.shape
    assert jnp.allclose(out2, ref2, atol=1e-4, rtol=1e-4), \
        float(jnp.max(jnp.abs(out2 - ref2)))

    # 3) Default bf16-operand path (f32 accumulation), looser tolerance.
    B3 = 512
    x3 = jax.random.normal(k_x, (B3, 55), jnp.float32)
    out3 = jax.block_until_ready(fwd(x3, params, tb=2048, use_bf16=True))
    ref3 = mlp_ref(x3, params)
    assert out3.shape == (B3, 1), out3.shape
    assert jnp.allclose(out3, ref3, atol=2e-2, rtol=2e-2)

    print("KERNEL_OK")
</pallas_src>

<mosaic_0001>
module attributes {stable_mosaic.version = 11 : i64} {
  func.func @_mlp_kernel(%arg0: i32, %arg1: memref<55x128xf32, #tpu.memory_space<vmem>>, %arg2: memref<300x55xf32, #tpu.memory_space<vmem>>, %arg3: memref<300x1xf32, #tpu.memory_space<vmem>>, %arg4: memref<100x300xf32, #tpu.memory_space<vmem>>, %arg5: memref<100x1xf32, #tpu.memory_space<vmem>>, %arg6: memref<1x100xf32, #tpu.memory_space<vmem>>, %arg7: memref<1x1xf32, #tpu.memory_space<vmem>>, %arg8: memref<1x128xf32, #tpu.memory_space<vmem>>) attributes {dimension_semantics = [#tpu.dimension_semantics<parallel>], iteration_bounds = array<i64: 1>, scalar_prefetch = 0 : i64, scratch_operands = 0 : i64, tpu.core_type = #tpu.core_type<tc>, window_params = [{transform_indices = @transform_0, window_bounds = array<i64: 55, 128>}, {pipeline_mode = #tpu.pipeline_mode<synchronous>, transform_indices = @transform_1, window_bounds = array<i64: 300, 55>}, {pipeline_mode = #tpu.pipeline_mode<synchronous>, transform_indices = @transform_2, window_bounds = array<i64: 300, 1>}, {pipeline_mode = #tpu.pipeline_mode<synchronous>, transform_indices = @transform_3, window_bounds = array<i64: 100, 300>}, {pipeline_mode = #tpu.pipeline_mode<synchronous>, transform_indices = @transform_4, window_bounds = array<i64: 100, 1>}, {pipeline_mode = #tpu.pipeline_mode<synchronous>, transform_indices = @transform_5, window_bounds = array<i64: 1, 100>}, {pipeline_mode = #tpu.pipeline_mode<synchronous>, transform_indices = @transform_6, window_bounds = array<i64: 1, 1>}, {transform_indices = @transform_7, window_bounds = array<i64: 1, 128>}]} {
    %c0 = arith.constant 0 : index
    %c0_0 = arith.constant 0 : index
    %0 = vector.load %arg2[%c0, %c0_0] : memref<300x55xf32, #tpu.memory_space<vmem>>, vector<300x55xf32>
    %c0_1 = arith.constant 0 : index
    %c0_2 = arith.constant 0 : index
    %1 = vector.load %arg1[%c0_1, %c0_2] : memref<55x128xf32, #tpu.memory_space<vmem>>, vector<55x128xf32>
    %cst = arith.constant dense<0.000000e+00> : vector<300x128xf32>
    %2 = tpu.matmul %0, %1, %cst {dimension_numbers = #tpu.dot_dimension_numbers<[1], [0], [0], [1], [0, 0, 1, 1], [], []>} : vector<300x55xf32>, vector<55x128xf32>, vector<300x128xf32> -> vector<300x128xf32>
    %c0_3 = arith.constant 0 : index
    %c0_4 = arith.constant 0 : index
    %3 = vector.load %arg3[%c0_3, %c0_4] : memref<300x1xf32, #tpu.memory_space<vmem>>, vector<300x1xf32>
    %4 = vector.broadcast %3 : vector<300x1xf32> to vector<300x128xf32>
    %5 = arith.addf %2, %4 : vector<300x128xf32>
    %cst_5 = arith.constant 0.000000e+00 : f32
    %6 = vector.broadcast %cst_5 : f32 to vector<300x128xf32>
    %7 = arith.maximumf %5, %6 : vector<300x128xf32>
    %c0_6 = arith.constant 0 : index
    %c0_7 = arith.constant 0 : index
    %8 = vector.load %arg4[%c0_6, %c0_7] : memref<100x300xf32, #tpu.memory_space<vmem>>, vector<100x300xf32>
    %cst_8 = arith.constant dense<0.000000e+00> : vector<100x128xf32>
    %9 = tpu.matmul %8, %7, %cst_8 {dimension_numbers = #tpu.dot_dimension_numbers<[1], [0], [0], [1], [0, 0, 1, 1], [], []>} : vector<100x300xf32>, vector<300x128xf32>, vector<100x128xf32> -> vector<100x128xf32>
    %c0_9 = arith.constant 0 : index
    %c0_10 = arith.constant 0 : index
    %10 = vector.load %arg5[%c0_9, %c0_10] : memref<100x1xf32, #tpu.memory_space<vmem>>, vector<100x1xf32>
    %11 = vector.broadcast %10 : vector<100x1xf32> to vector<100x128xf32>
    %12 = arith.addf %9, %11 : vector<100x128xf32>
    %cst_11 = arith.constant 0.000000e+00 : f32
    %13 = vector.broadcast %cst_11 : f32 to vector<100x128xf32>
    %14 = arith.maximumf %12, %13 : vector<100x128xf32>
    %c0_12 = arith.constant 0 : index
    %c0_13 = arith.constant 0 : index
    %15 = vector.load %arg6[%c0_12, %c0_13] : memref<1x100xf32, #tpu.memory_space<vmem>>, vector<1x100xf32>
    %cst_14 = arith.constant dense<0.000000e+00> : vector<1x128xf32>
    %16 = tpu.matmul %15, %14, %cst_14 {dimension_numbers = #tpu.dot_dimension_numbers<[1], [0], [0], [1], [0, 0, 1, 1], [], []>} : vector<1x100xf32>, vector<100x128xf32>, vector<1x128xf32> -> vector<1x128xf32>
    %c0_15 = arith.constant 0 : index
    %c0_16 = arith.constant 0 : index
    %17 = vector.load %arg7[%c0_15, %c0_16] : memref<1x1xf32, #tpu.memory_space<vmem>>, vector<1x1xf32>
    %18 = vector.broadcast %17 : vector<1x1xf32> to vector<1x128xf32>
    %19 = arith.addf %16, %18 : vector<1x128xf32>
    %cst_17 = arith.constant 0.000000e+00 : f32
    %20 = vector.broadcast %cst_17 : f32 to vector<1x128xf32>
    %21 = arith.subf %20, %19 : vector<1x128xf32>
    %22 = math.exp %21 : vector<1x128xf32>
    %cst_18 = arith.constant 1.000000e+00 : f32
    %23 = vector.broadcast %cst_18 : f32 to vector<1x128xf32>
    %24 = arith.addf %23, %22 : vector<1x128xf32>
    %cst_19 = arith.constant 1.000000e+00 : f32
    %25 = vector.broadcast %cst_19 : f32 to vector<1x128xf32>
    %26 = arith.divf %25, %24 : vector<1x128xf32>
    %c0_20 = arith.constant 0 : index
    %c0_21 = arith.constant 0 : index
    %27 = vector.load %arg8[%c0_20, %c0_21] : memref<1x128xf32, #tpu.memory_space<vmem>>, vector<1x128xf32>
    tpu.vector_store %arg8[%c0_20, %c0_21], %26 {strides = array<i32>} : memref<1x128xf32, #tpu.memory_space<vmem>>, vector<1x128xf32>,
    return
  }
  func.func @transform_0(%arg0: i32) -> (i32, i32) {
    %c0_i32 = arith.constant 0 : i32
    %c0_i32_0 = arith.constant 0 : i32
    return %c0_i32, %arg0 : i32, i32
  }
  func.func @transform_1(%arg0: i32) -> (i32, i32) {
    %c0_i32 = arith.constant 0 : i32
    %c0_i32_0 = arith.constant 0 : i32
    %c0_i32_1 = arith.constant 0 : i32
    return %c0_i32, %c0_i32_0 : i32, i32
  }
  func.func @transform_2(%arg0: i32) -> (i32, i32) {
    %c0_i32 = arith.constant 0 : i32
    %c0_i32_0 = arith.constant 0 : i32
    %c0_i32_1 = arith.constant 0 : i32
    return %c0_i32, %c0_i32_0 : i32, i32
  }
  func.func @transform_3(%arg0: i32) -> (i32, i32) {
    %c0_i32 = arith.constant 0 : i32
    %c0_i32_0 = arith.constant 0 : i32
    %c0_i32_1 = arith.constant 0 : i32
    return %c0_i32, %c0_i32_0 : i32, i32
  }
  func.func @transform_4(%arg0: i32) -> (i32, i32) {
    %c0_i32 = arith.constant 0 : i32
    %c0_i32_0 = arith.constant 0 : i32
    %c0_i32_1 = arith.constant 0 : i32
    return %c0_i32, %c0_i32_0 : i32, i32
  }
  func.func @transform_5(%arg0: i32) -> (i32, i32) {
    %c0_i32 = arith.constant 0 : i32
    %c0_i32_0 = arith.constant 0 : i32
    %c0_i32_1 = arith.constant 0 : i32
    return %c0_i32, %c0_i32_0 : i32, i32
  }
  func.func @transform_6(%arg0: i32) -> (i32, i32) {
    %c0_i32 = arith.constant 0 : i32
    %c0_i32_0 = arith.constant 0 : i32
    %c0_i32_1 = arith.constant 0 : i32
    return %c0_i32, %c0_i32_0 : i32, i32
  }
  func.func @transform_7(%arg0: i32) -> (i32, i32) {
    %c0_i32 = arith.constant 0 : i32
    %c0_i32_0 = arith.constant 0 : i32
    return %c0_i32, %arg0 : i32, i32
  }
}

</mosaic_0001>

<bundles_post_ra>
// kernel: mlp_forward.1
= control target key start
LH: loop header
LB: loop body
LE: loop exit
PB: predicated region body
PF: predicated region fallthrough
CT: control target
= control target key end

     0   :  { %v1692_v0 = vmov 0   ;;  %vm301_vm0 = vcmask 449536   ;;  %vm416_vm1 = vcmask 1046528   ;;  %vm1694_vm2 = vmmov 0   ;;  %s2293_s2 = inlined_call_operand.vmem [shape: f32[300,1], index: 2, kind: input, shape index: {}]   ;;  %s2294_s0 = inlined_call_operand.vmem [shape: f32[55,128], index: 0, kind: input, shape index: {}]   ;;  %s2295_s6 = inlined_call_operand.<no memory space> [shape: f32[1,1], index: 6, kind: input, shape index: {}]   ;;  %s2296_s1 = inlined_call_operand.vmem [shape: f32[300,55], index: 1, kind: input, shape index: {}]   ;;  %s2297_s4 = inlined_call_operand.vmem [shape: f32[100,1], index: 4, kind: input, shape index: {}]   ;;  %s2298_s3 = inlined_call_operand.vmem [shape: f32[100,300], index: 3, kind: input, shape index: {}]   ;;  %s2299_s5 = inlined_call_operand.vmem [shape: f32[1,100], index: 5, kind: input, shape index: {}]   ;;  %s2300_s7 = inlined_call_operand.vmem [shape: f32[1,128], index: 7, kind: output, shape index: {}]  }
   0x1   :  { %1687 = vset.pattern.permute.xlu1 %v1692_v0  ;;  %1686 = vset.pattern.permute.xlu0 %v1692_v0  ;;  %v89_v1 = vld [vmem:[%s2293_s2 + $0x80] sm:$0xff]  ;;  %v12_v4 = vstv %s2295_s6  ;;  %v67_v5 = vld [vmem:[%s2294_s0 + $0x8] sm:$0xff]  ;;  %v68_v7 = vld [vmem:[%s2294_s0 + $0x10] sm:$0xff]  ;;  %vm870_vm3 = vcmask 1043456   ;;  %vm1696_vm4 = vmmov 1   ;;  %vm830_vm6 = vcmask 359424  }
   0x2   :  { %v73_v2 = vld [vmem:[%s2293_s2] sm:$0xff]  ;;  %193 = vperm.xlu0 %1686, %v89_v1   ;;  %13 = vst [vmem:[#allocation2] sm:$0x1] %v12_v4  ;;  %v69_v8 = vld [vmem:[%s2294_s0 + $0x18] sm:$0xff]  ;;  %v90_v9 = vld [vmem:[%s2293_s2 + $0x88] sm:$0xff]  ;;  %vm1158_vm7 = vcmask 818176  }
   0x3   :  { %v66_v3 = vld [vmem:[%s2294_s0] sm:$0xff]  ;;  %113 = vperm.xlu1 %1687, %v73_v2   ;;  %v74_v10 = vld [vmem:[%s2293_s2 + $0x8] sm:$0xff]  ;;  %v1605_v11 = vpack.c.bf16 %v69_v8, %v68_v7  ;;  %v91_v16 = vld [vmem:[%s2293_s2 + $0x90] sm:$0xff] }
   0x4   :  { %v1601_v6 = vpack.c.bf16 %v67_v5, %v66_v3  ;;  %v70_v12 = vld [vmem:[%s2294_s0 + $0x20] sm:$0xff]  ;;  %v71_v13 = vld [vmem:[%s2294_s0 + $0x28] sm:$0xff]  ;;  %v92_v17 = vld [vmem:[%s2293_s2 + $0x98] sm:$0xff] }
   0x5   :  { %v28_v14 = vld [vmem:[%s2296_s1] sm:$0xff]  ;;  %v1609_v18 = vpack.c.bf16 %v71_v13, %v70_v12  ;;  %v75_v19 = vld [vmem:[%s2293_s2 + $0x10] sm:$0xff]  ;;  %v76_v20 = vld [vmem:[%s2293_s2 + $0x18] sm:$0xff] }
   0x6   :  { %1602 = vmatprep.subr.bf16.mxu0 %v1601_v6  ;;  %1673 = vmatprep.subr.bf16.mxu1 %v1601_v6  ;;  %v44_v15 = vld [vmem:[%s2296_s1 + $0x80] sm:$0xff]  ;;  %v72_v21 = vld [vmem:[%s2294_s0 + $0x30] sm:$0x7f]  ;;  %v94_v23 = vld [vmem:[%s2293_s2 + $0xa8] sm:$0xff] }
   0x7   :  { %1604 = vmatpush3.bf16.msra.mxu0 %v1601_v6  ;;  %1677 = vmatpush3.bf16.msra.mxu1 %v1601_v6  ;;  %v93_v22 = vld [vmem:[%s2293_s2 + $0xa0] sm:$0xff]  ;;  %v29_v24 = vld [vmem:[%s2296_s1 + $0x8] sm:$0xff]  ;;  %v30_v26 = vld [vmem:[%s2296_s1 + $0x10] sm:$0xff] }
   0x8   :  { %198 = vperm.xlu0 %1686, %v90_v9   ;;  %118 = vperm.xlu1 %1687, %v74_v10   ;;  %v45_v25 = vld [vmem:[%s2296_s1 + $0x88] sm:$0xff]  ;;  %v46_v27 = vld [vmem:[%s2296_s1 + $0x90] sm:$0xff]  ;;  %v77_v28 = vld [vmem:[%s2293_s2 + $0x20] sm:$0xff] }
   0x9   :  { %1606 = vmatprep.subr.bf16.mxu0 %v1605_v11  ;;  %1674 = vmatprep.subr.bf16.mxu1 %v1605_v11  ;;  %v78_v29 = vld [vmem:[%s2293_s2 + $0x28] sm:$0xff]  ;;  %v31_v30 = vld [vmem:[%s2296_s1 + $0x18] sm:$0xff]  ;;  %v32_v32 = vld [vmem:[%s2296_s1 + $0x20] sm:$0xff] }
   0xa   :  { %1464 = vmatprep.mubr.msk.f32.mxu0 %vm301_vm0, %v28_v14  ;;  %1488 = vmatprep.mubr.msk.f32.mxu1 %vm301_vm0, %v44_v15  ;;  %v47_v31 = vld [vmem:[%s2296_s1 + $0x98] sm:$0xff]  ;;  %v48_v33 = vld [vmem:[%s2296_s1 + $0xa0] sm:$0xff]  ;;  %v95_v34 = vld [vmem:[%s2293_s2 + $0xb0] sm:$0xff] }
   0xb   :  { %1608 = vmatpush3.bf16.msra.mxu0 %v1605_v11  ;;  %1678 = vmatpush3.bf16.msra.mxu1 %v1605_v11  ;;  %v96_v35 = vld [vmem:[%s2293_s2 + $0xb8] sm:$0xff]  ;;  %v33_v36 = vld [vmem:[%s2296_s1 + $0x28] sm:$0xff]  ;;  %v34_v38 = vld [vmem:[%s2296_s1 + $0x30] sm:$0xff] }
   0xc   :  { %203 = vperm.xlu0 %1686, %v91_v16   ;;  %208 = vperm.xlu1 %1687, %v92_v17   ;;  %v49_v37 = vld [vmem:[%s2296_s1 + $0xa8] sm:$0xff]  ;;  %v50_v39 = vld [vmem:[%s2296_s1 + $0xb0] sm:$0xff]  ;;  %v80_v41 = vld [vmem:[%s2293_s2 + $0x38] sm:$0xff] }
   0xd   :  { %1610 = vmatprep.subr.bf16.mxu0 %v1609_v18  ;;  %1675 = vmatprep.subr.bf16.mxu1 %v1609_v18  ;;  %v79_v40 = vld [vmem:[%s2293_s2 + $0x30] sm:$0xff]  ;;  %v35_v42 = vld [vmem:[%s2296_s1 + $0x38] sm:$0xff]  ;;  %v36_v44 = vld [vmem:[%s2296_s1 + $0x40] sm:$0xff] }
   0xe   :  { %v51_v43 = vld [vmem:[%s2296_s1 + $0xb8] sm:$0xff]  ;;  %v52_v45 = vld [vmem:[%s2296_s1 + $0xc0] sm:$0xff]  ;;  %v98_v47 = vld [vmem:[%s2293_s2 + $0xc8] sm:$0xff] }
   0xf   :  { %1612 = vmatpush3.bf16.msra.mxu0 %v1609_v18  ;;  %1679 = vmatpush3.bf16.msra.mxu1 %v1609_v18  ;;  %v97_v46 = vld [vmem:[%s2293_s2 + $0xc0] sm:$0xff]  ;;  %v37_v48 = vld [vmem:[%s2296_s1 + $0x48] sm:$0xff]  ;;  %v38_v50 = vld [vmem:[%s2296_s1 + $0x50] sm:$0xff] }
  0x10   :  { %123 = vperm.xlu0 %1686, %v75_v19   ;;  %128 = vperm.xlu1 %1687, %v76_v20   ;;  %v53_v49 = vld [vmem:[%s2296_s1 + $0xc8] sm:$0xff]  ;;  %v54_v51 = vld [vmem:[%s2296_s1 + $0xd0] sm:$0xff]  ;;  %v81_v52 = vld [vmem:[%s2293_s2 + $0x40] sm:$0xff] }
  0x11   :  { %1462 = vmatprep.subr.msk.mxu0 %vm416_vm1, %v72_v21  ;;  %1676 = vmatprep.subr.msk.mxu1 %vm416_vm1, %v72_v21  ;;  %v82_v53 = vld [vmem:[%s2293_s2 + $0x48] sm:$0xff]  ;;  %v39_v54 = vld [vmem:[%s2296_s1 + $0x58] sm:$0xff]  ;;  %v40_v56 = vld [vmem:[%s2296_s1 + $0x60] sm:$0xff] }
  0x12   :  { %v55_v55 = vld [vmem:[%s2296_s1 + $0xd8] sm:$0xff]  ;;  %v56_v57 = vld [vmem:[%s2296_s1 + $0xe0] sm:$0xff]  ;;  %v99_v58 = vld [vmem:[%s2293_s2 + $0xd0] sm:$0xff] }
  0x13   :  { %1463 = vmatpush3.msk.msra.mxu0 %vm416_vm1, %v72_v21  ;;  %1680 = vmatpush3.msk.msra.mxu1 %vm416_vm1, %v72_v21  ;;  %v100_v59 = vld [vmem:[%s2293_s2 + $0xd8] sm:$0xff]  ;;  %v41_v60 = vld [vmem:[%s2296_s1 + $0x68] sm:$0xff]  ;;  %v42_v62 = vld [vmem:[%s2296_s1 + $0x70] sm:$0xff] }
  0x14   :  { %213 = vperm.xlu0 %1686, %v93_v22   ;;  %218 = vperm.xlu1 %1687, %v94_v23   ;;  %v57_v61 = vld [vmem:[%s2296_s1 + $0xe8] sm:$0xff]  ;;  %v58_v63 = vld [vmem:[%s2296_s1 + $0xf0] sm:$0xff]  ;;  %v84_v1 = vld [vmem:[%s2293_s2 + $0x58] sm:$0xff] }
  0x15   :  { %1465 = vmatmul.mubr.msk.f32.vlgmr.msra.gmra.mrb[0].mxu0 %vm301_vm0, %v29_v24  ;;  %1489 = vmatmul.mubr.msk.f32.vlgmr.msra.gmra.mrb[0].mxu1 %vm301_vm0, %v45_v25  ;;  %v83_v0 = vld [vmem:[%s2293_s2 + $0x50] sm:$0xff]  ;;  %v43_v2 = vld [vmem:[%s2296_s1 + $0x78] sm:$0xff]  ;;  %v60_v4 = vld [vmem:[%s2296_s1 + $0x100] sm:$0xff] }
  0x16   :  { %1467 = vmatprep.mubr.msk.f32.mxu0 %vm301_vm0, %v30_v26  ;;  %1491 = vmatprep.mubr.msk.f32.mxu1 %vm301_vm0, %v46_v27  ;;  %v59_v3 = vld [vmem:[%s2296_s1 + $0xf8] sm:$0xff]  ;;  %v101_v5 = vld [vmem:[%s2293_s2 + $0xe0] sm:$0xff]  ;;  %v102_v6 = vld [vmem:[%s2293_s2 + $0xe8] sm:$0xff] }
  0x17   :  { %v61_v7 = vld [vmem:[%s2296_s1 + $0x108] sm:$0xff]  ;;  %v62_v8 = vld [vmem:[%s2296_s1 + $0x110] sm:$0xff]  ;;  %v85_v9 = vld [vmem:[%s2293_s2 + $0x60] sm:$0xff] }
  0x18   :  { %133 = vperm.xlu0 %1686, %v77_v28   ;;  %138 = vperm.xlu1 %1687, %v78_v29   ;;  %v86_v10 = vld [vmem:[%s2293_s2 + $0x68] sm:$0xff]  ;;  %v63_v11 = vld [vmem:[%s2296_s1 + $0x118] sm:$0xff]  ;;  %v64_v12 = vld [vmem:[%s2296_s1 + $0x120] sm:$0xff] }
  0x19   :  { %1468 = vmatmul.mubr.msk.f32.gmra.mrb[2].mxu0 %vm301_vm0, %v31_v30  ;;  %1492 = vmatmul.mubr.msk.f32.gmra.mrb[2].mxu1 %vm301_vm0, %v47_v31  ;;  %v105_v13 = vld [vmem:[%s2293_s2 + $0x100] sm:$0xff]  ;;  %v106_v14 = vld [vmem:[%s2293_s2 + $0x108] sm:$0xff]  ;;  %v103_v16 = vld [vmem:[%s2293_s2 + $0xf0] sm:$0xff] }
  0x1a   :  { %1470 = vmatprep.mubr.msk.f32.mxu0 %vm301_vm0, %v32_v32  ;;  %1494 = vmatprep.mubr.msk.f32.mxu1 %vm301_vm0, %v48_v33  ;;  %v65_v15 = vld [vmem:[%s2296_s1 + $0x128] sm:$0xf]  ;;  %v104_v17 = vld [vmem:[%s2293_s2 + $0xf8] sm:$0xff]  ;;  %v87_v18 = vld [vmem:[%s2293_s2 + $0x70] sm:$0xff] }
  0x1b   :  { %v88_v19 = vld [vmem:[%s2293_s2 + $0x78] sm:$0xff]  ;;  %v107_v20 = vld [vmem:[%s2293_s2 + $0x110] sm:$0xff]  ;;  %v109_v22 = vld [vmem:[%s2293_s2 + $0x120] sm:$0xff] }
  0x1c   :  { %223 = vperm.xlu0 %1686, %v95_v34   ;;  %228 = vperm.xlu1 %1687, %v96_v35   ;;  %v108_v21 = vld [vmem:[%s2293_s2 + $0x118] sm:$0xff]  ;;  %v110_v23 = vld [vmem:[%s2293_s2 + $0x128] sm:$0xf]  ;;  %v752_v24 = vld [vmem:[%s2297_s4] sm:$0xff] }
  0x1d   :  { %1471 = vmatmul.mubr.msk.f32.gmra.mrb[4].mxu0 %vm301_vm0, %v33_v36  ;;  %1495 = vmatmul.mubr.msk.f32.gmra.mrb[4].mxu1 %vm301_vm0, %v49_v37  ;;  %v753_v25 = vld [vmem:[%s2297_s4 + $0x8] sm:$0xff]  ;;  %v754_v26 = vld [vmem:[%s2297_s4 + $0x10] sm:$0xff]  ;;  %v755_v27 = vld [vmem:[%s2297_s4 + $0x18] sm:$0xff] }
  0x1e   :  { %1473 = vmatprep.mubr.msk.f32.mxu0 %vm301_vm0, %v34_v38  ;;  %1497 = vmatprep.mubr.msk.f32.mxu1 %vm301_vm0, %v50_v39  ;;  %v756_v28 = vld [vmem:[%s2297_s4 + $0x20] sm:$0xff]  ;;  %v757_v29 = vld [vmem:[%s2297_s4 + $0x28] sm:$0xff]  ;;  %v758_v30 = vld [vmem:[%s2297_s4 + $0x30] sm:$0xff]  ;;  %v1693_v39 = vmov 0.0|0.0  }
  0x1f   :  { %v759_v31 = vld [vmem:[%s2297_s4 + $0x38] sm:$0xff]  ;;  %v760_v32 = vld [vmem:[%s2297_s4 + $0x40] sm:$0xff]  ;;  %v761_v33 = vld [vmem:[%s2297_s4 + $0x48] sm:$0xff]  ;;  %1645 = vmatprep.subr.bf16.mxu1 %v1693_v39 }
  0x20   :  { %143 = vperm.xlu0 %1686, %v79_v40   ;;  %148 = vperm.xlu1 %1687, %v80_v41   ;;  %v762_v34 = vld [vmem:[%s2297_s4 + $0x50] sm:$0xff]  ;;  %v763_v35 = vld [vmem:[%s2297_s4 + $0x58] sm:$0xff]  ;;  %v764_v36 = vld [vmem:[%s2297_s4 + $0x60] sm:$0xf]  ;;  %v1695_v40 = vmov 0.0  }
  0x21   :  { %1474 = vmatmul.mubr.msk.f32.gmra.mrb[6].mxu0 %vm301_vm0, %v35_v42  ;;  %1498 = vmatmul.mubr.msk.f32.gmra.mrb[6].mxu1 %vm301_vm0, %v51_v43  ;;  %v1148_v37 = vld [vmem:[#allocation2] sm:$0x1]  ;;  %v714_v38 = vld [vmem:[%s2298_s3 + $0x8] sm:$0xff]  ;;  %vm1653_vm5 = vmpackc.low %vm870_vm3, %vm1696_vm4 }
  0x22   :  { %1476 = vmatprep.mubr.msk.f32.mxu0 %vm301_vm0, %v36_v44  ;;  %1500 = vmatprep.mubr.msk.f32.mxu1 %vm301_vm0, %v52_v45 }
  0x24   :  { %233 = vperm.xlu0 %1686, %v97_v46   ;;  %238 = vperm.xlu1 %1687, %v98_v47  }
  0x25   :  { %1477 = vmatmul.mubr.msk.f32.gmra.mrb[8].mxu0 %vm301_vm0, %v37_v48  ;;  %1501 = vmatmul.mubr.msk.f32.gmra.mrb[8].mxu1 %vm301_vm0, %v53_v49 }
  0x26   :  { %1479 = vmatprep.mubr.msk.f32.mxu0 %vm301_vm0, %v38_v50  ;;  %1503 = vmatprep.mubr.msk.f32.mxu1 %vm301_vm0, %v54_v51 }
  0x28   :  { %153 = vperm.xlu0 %1686, %v81_v52   ;;  %158 = vperm.xlu1 %1687, %v82_v53  }
  0x29   :  { %1480 = vmatmul.mubr.msk.f32.gmra.mrb[10].mxu0 %vm301_vm0, %v39_v54  ;;  %1504 = vmatmul.mubr.msk.f32.gmra.mrb[10].mxu1 %vm301_vm0, %v55_v55 }
  0x2a   :  { %1482 = vmatprep.mubr.msk.f32.mxu0 %vm301_vm0, %v40_v56  ;;  %1506 = vmatprep.mubr.msk.f32.mxu1 %vm301_vm0, %v56_v57 }
  0x2c   :  { %243 = vperm.xlu0 %1686, %v99_v58   ;;  %248 = vperm.xlu1 %1687, %v100_v59  }
  0x2d   :  { %1483 = vmatmul.mubr.msk.f32.gmra.mrb[12].mxu0 %vm301_vm0, %v41_v60  ;;  %1507 = vmatmul.mubr.msk.f32.gmra.mrb[12].mxu1 %vm301_vm0, %v57_v61 }
  0x2e   :  { %1485 = vmatprep.mubr.msk.f32.mxu0 %vm301_vm0, %v42_v62  ;;  %1509 = vmatprep.mubr.msk.f32.mxu1 %vm301_vm0, %v58_v63 }
  0x30   :  { %163 = vperm.xlu0 %1686, %v83_v0   ;;  %168 = vperm.xlu1 %1687, %v84_v1  }
  0x31   :  { %1486 = vmatmul.mubr.msk.f32.gmra.mrb[14].mxu0 %vm301_vm0, %v43_v2  ;;  %1510 = vmatmul.mubr.msk.f32.gmra.mrb[14].mxu1 %vm301_vm0, %v59_v3 }
  0x32   :  { %1512 = vmatprep.mubr.msk.f32.mxu1 %vm301_vm0, %v60_v4  ;;  %938 = vmatprep.mubr.f32.mxu0 %v714_v38 }
  0x34   :  { %253 = vperm.xlu0 %1686, %v101_v5   ;;  %258 = vperm.xlu1 %1687, %v102_v6  }
  0x35   :  { %1513 = vmatmul.mubr.msk.f32.gmra.mrb[16].mxu1 %vm301_vm0, %v61_v7 }
  0x36   :  { %1515 = vmatprep.mubr.msk.f32.mxu1 %vm301_vm0, %v62_v8 }
  0x38   :  { %173 = vperm.xlu0 %1686, %v85_v9   ;;  %178 = vperm.xlu1 %1687, %v86_v10  }
  0x39   :  { %1516 = vmatmul.mubr.msk.f32.gmra.mrb[18].mxu1 %vm301_vm0, %v63_v11 }
  0x3a   :  { %1518 = vmatprep.mubr.msk.f32.mxu1 %vm301_vm0, %v64_v12 }
  0x3c   :  { %273 = vperm.xlu0 %1686, %v105_v13   ;;  %278 = vperm.xlu1 %1687, %v106_v14  }
  0x3d   :  { %1519 = vmatmul.mubr.msk.f32.gmra.mrb[20].mxu1 %vm301_vm0, %v65_v15 }
  0x3e   :  { %1533 = vmatprep.mubr.msk.f32.mxu1 %vm1694_vm2, %v1695_v40 }
  0x40   :  { %263 = vperm.xlu0 %1686, %v103_v16   ;;  %268 = vperm.xlu1 %1687, %v104_v17  }
  0x44   :  { %183 = vperm.xlu0 %1686, %v87_v18   ;;  %188 = vperm.xlu1 %1687, %v88_v19  }
  0x48   :  { %283 = vperm.xlu0 %1686, %v107_v20   ;;  %288 = vperm.xlu1 %1687, %v108_v21  }
  0x4c   :  { %293 = vperm.xlu0 %1686, %v109_v22   ;;  %298 = vperm.xlu1 %1687, %v110_v23  }
  0x50   :  { %767 = vperm.xlu0 %1686, %v752_v24   ;;  %772 = vperm.xlu1 %1687, %v753_v25  }
  0x54   :  { %777 = vperm.xlu0 %1686, %v754_v26   ;;  %782 = vperm.xlu1 %1687, %v755_v27  }
  0x58   :  { %787 = vperm.xlu0 %1686, %v756_v28   ;;  %792 = vperm.xlu1 %1687, %v757_v29  }
  0x5c   :  { %797 = vperm.xlu0 %1686, %v758_v30   ;;  %802 = vperm.xlu1 %1687, %v759_v31  }
  0x60   :  { %807 = vperm.xlu0 %1686, %v760_v32   ;;  %812 = vperm.xlu1 %1687, %v761_v33  }
  0x64   :  { %817 = vperm.xlu0 %1686, %v762_v34   ;;  %822 = vperm.xlu1 %1687, %v763_v35  }
  0x68   :  { %827 = vperm.xlu0 %1686, %v764_v36   ;;  %1151 = vperm.xlu1 %1687, %v1148_v37  }
  0x81   :  { %v194_v41 = vpop.permute.xlu0 %193 }
  0x82   :  { %v114_v42 = vpop.permute.xlu1 %113 }
  0x87   :  { %v199_v43 = vpop.permute.xlu0 %198  ;;  %v119_v44 = vpop.permute.xlu1 %118 }
  0x8b   :  { %v204_v45 = vpop.permute.xlu0 %203  ;;  %v209_v46 = vpop.permute.xlu1 %208 }
  0x8f   :  { %v124_v47 = vpop.permute.xlu0 %123  ;;  %v129_v48 = vpop.permute.xlu1 %128 }
  0x93   :  { %v214_v49 = vpop.permute.xlu0 %213  ;;  %v219_v50 = vpop.permute.xlu1 %218 }
  0x97   :  { %v134_v51 = vpop.permute.xlu0 %133  ;;  %v139_v52 = vpop.permute.xlu1 %138 }
  0x9b   :  { %v2072_v53 = vpop.permute.xlu0 %223  ;;  %v2074_v54 = vpop.permute.xlu1 %228 }
  0x9f   :  { %v2076_v55 = vpop.permute.xlu0 %143  ;;  %v149_v56 = vpop.permute.xlu1 %148 }
  0xa3   :  { %v2078_v57 = vpop.permute.xlu0 %233  ;;  %v2080_v58 = vpop.permute.xlu1 %238 }
  0xa7   :  { %v2082_v59 = vpop.permute.xlu0 %153  ;;  %v2084_v60 = vpop.permute.xlu1 %158 }
  0xab   :  { %v2086_v61 = vpop.permute.xlu0 %243  ;;  %v2088_v62 = vpop.permute.xlu1 %248 }
  0xaf   :  { %v2090_v63 = vpop.permute.xlu0 %163  ;;  %v2092_v0 = vpop.permute.xlu1 %168 }
  0xb3   :  { %v2094_v1 = vpop.permute.xlu0 %253  ;;  %v2096_v2 = vpop.permute.xlu1 %258 }
  0xb7   :  { %v2098_v11 = vpop.permute.xlu0 %173  ;;  %v2100_v12 = vpop.permute.xlu1 %178 }
  0xe8   :  { %v1466_v3 = vpop.f32.mrb[0].mxu0  ;;  %v1490_v4 = vpop.f32.mrb[0].mxu1 }
  0xe9   :  { %v492_v5 = vadd.f32 %v1466_v3, %v119_v44  ;;  %v572_v6 = vadd.f32 %v1490_v4, %v199_v43  ;;  %v486_v7 = vpop.f32.mrb[1].mxu0  ;;  %v566_v8 = vpop.f32.mrb[1].mxu1 }
  0xea   :  { %v487_v9 = vadd.f32 %v486_v7, %v114_v42  ;;  %v567_v10 = vadd.f32 %v566_v8, %v194_v41  ;;  %v2102_v43 = vpop.permute.xlu0 %273  ;;  %v2104_v44 = vpop.permute.xlu1 %278 }
  0xeb   :  { %v676_v13 = vmax.f32 %v492_v5, 0.0  ;;  %v692_v14 = vmax.f32 %v572_v6, 0.0 }
  0xec   :  { %v675_v15 = vmax.f32 %v487_v9, 0.0  ;;  %v691_v16 = vmax.f32 %v567_v10, 0.0  ;;  %v1469_v17 = vpop.f32.mrb[2].mxu0  ;;  %v1493_v18 = vpop.f32.mrb[2].mxu1 }
  0xed   :  { %v502_v19 = vadd.f32 %v1469_v17, %v129_v48  ;;  %v582_v20 = vadd.f32 %v1493_v18, %v209_v46  ;;  %v496_v21 = vpop.f32.mrb[3].mxu0  ;;  %v576_v22 = vpop.f32.mrb[3].mxu1 }
  0xee   :  { %v1615_v23 = vpack.c.bf16 %v676_v13, %v675_v15  ;;  %v1613_v24 = vpack.c.bf16 %v692_v14, %v691_v16  ;;  %v497_v25 = vadd.f32 %v496_v21, %v124_v47  ;;  %v577_v26 = vadd.f32 %v576_v22, %v204_v45  ;;  %v264_v21 = vpop.permute.xlu0 %263  ;;  %v269_v22 = vpop.permute.xlu1 %268 }
  0xef   :  { %v678_v27 = vmax.f32 %v502_v19, 0.0  ;;  %v694_v28 = vmax.f32 %v582_v20, 0.0 }
  0xf0   :  { %v677_v29 = vmax.f32 %v497_v25, 0.0  ;;  %v693_v30 = vmax.f32 %v577_v26, 0.0  ;;  %v1472_v31 = vpop.f32.mrb[4].mxu0  ;;  %v1496_v32 = vpop.f32.mrb[4].mxu1  ;;  %1614 = vmatprep.subr.bf16.mxu0 %v1613_v24 }
  0xf1   :  { %v512_v33 = vadd.f32 %v1472_v31, %v139_v52  ;;  %v592_v34 = vadd.f32 %v1496_v32, %v219_v50  ;;  %v506_v35 = vpop.f32.mrb[5].mxu0  ;;  %v586_v36 = vpop.f32.mrb[5].mxu1  ;;  %1616 = vmatpush3.bf16.msra.mxu0 %v1615_v23 }
  0xf2   :  { %v1619_v37 = vpack.c.bf16 %v678_v27, %v677_v29  ;;  %v1617_v38 = vpack.c.bf16 %v694_v28, %v693_v30  ;;  %v507_v41 = vadd.f32 %v506_v35, %v134_v51  ;;  %v587_v42 = vadd.f32 %v586_v36, %v214_v49 }
  0xf3   :  { %v680_v45 = vmax.f32 %v512_v33, 0.0  ;;  %v696_v46 = vmax.f32 %v592_v34, 0.0 }
  0xf4   :  { %v679_v47 = vmax.f32 %v507_v41, 0.0  ;;  %v695_v48 = vmax.f32 %v587_v42, 0.0  ;;  %v1475_v3 = vpop.f32.mrb[6].mxu0  ;;  %v1499_v4 = vpop.f32.mrb[6].mxu1  ;;  %1618 = vmatprep.subr.bf16.mxu0 %v1617_v38 }
  0xf5   :  { %v522_v52 = vadd.f32 %v1475_v3, %v149_v56  ;;  %v602_v50 = vadd.f32 %v1499_v4, %v2074_v54  ;;  %v516_v5 = vpop.f32.mrb[7].mxu0  ;;  %v596_v6 = vpop.f32.mrb[7].mxu1  ;;  %1620 = vmatpush3.bf16.msra.mxu0 %v1619_v37 }
  0xf6   :  { %v1623_v7 = vpack.c.bf16 %v680_v45, %v679_v47  ;;  %v1621_v51 = vpack.c.bf16 %v696_v46, %v695_v48  ;;  %v517_v49 = vadd.f32 %v516_v5, %v2076_v55  ;;  %v597_v8 = vadd.f32 %v596_v6, %v2072_v53  ;;  %v184_v47 = vpop.permute.xlu0 %183  ;;  %v189_v48 = vpop.permute.xlu1 %188 }
  0xf7   :  { %v682_v9 = vmax.f32 %v522_v52, 0.0  ;;  %v698_v10 = vmax.f32 %v602_v50, 0.0 }
  0xf8   :  { %v681_v13 = vmax.f32 %v517_v49, 0.0  ;;  %v697_v14 = vmax.f32 %v597_v8, 0.0  ;;  %v1478_v15 = vpop.f32.mrb[8].mxu0  ;;  %v1502_v16 = vpop.f32.mrb[8].mxu1  ;;  %1622 = vmatprep.subr.bf16.mxu0 %v1621_v51 }
  0xf9   :  { %v532_v56 = vadd.f32 %v1478_v15, %v2084_v60  ;;  %v612_v54 = vadd.f32 %v1502_v16, %v2080_v58  ;;  %v526_v17 = vpop.f32.mrb[9].mxu0  ;;  %v606_v18 = vpop.f32.mrb[9].mxu1  ;;  %1624 = vmatpush3.bf16.msra.mxu0 %v1623_v7 }
  0xfa   :  { %v1627_v19 = vpack.c.bf16 %v682_v9, %v681_v13  ;;  %v1625_v20 = vpack.c.bf16 %v698_v10, %v697_v14  ;;  %v527_v55 = vadd.f32 %v526_v17, %v2082_v59  ;;  %v607_v53 = vadd.f32 %v606_v18, %v2078_v57 }
  0xfb   :  { %v684_v23 = vmax.f32 %v532_v56, 0.0  ;;  %v700_v24 = vmax.f32 %v612_v54, 0.0  ;;  %v289_v54 = vpop.permute.xlu1 %288 }
  0xfc   :  { %v683_v25 = vmax.f32 %v527_v55, 0.0  ;;  %v699_v26 = vmax.f32 %v607_v53, 0.0  ;;  %v1481_v27 = vpop.f32.mrb[10].mxu0  ;;  %v1505_v28 = vpop.f32.mrb[10].mxu1  ;;  %1626 = vmatprep.subr.bf16.mxu0 %v1625_v20 }
  0xfd   :  { %v542_v58 = vadd.f32 %v1481_v27, %v2092_v0  ;;  %v622_v60 = vadd.f32 %v1505_v28, %v2088_v62  ;;  %v536_v29 = vpop.f32.mrb[11].mxu0  ;;  %v616_v30 = vpop.f32.mrb[11].mxu1  ;;  %1628 = vmatpush3.bf16.msra.mxu0 %v1627_v19 }
  0xfe   :  { %v1631_v31 = vpack.c.bf16 %v684_v23, %v683_v25  ;;  %v1629_v59 = vpack.c.bf16 %v700_v24, %v699_v26  ;;  %v537_v57 = vadd.f32 %v536_v29, %v2090_v63  ;;  %v617_v32 = vadd.f32 %v616_v30, %v2086_v61  ;;  %v284_v20 = vpop.permute.xlu0 %283  ;;  %v713_v24 = vld [vmem:[%s2298_s3] sm:$0xff] }
  0xff   :  { %v686_v33 = vmax.f32 %v542_v58, 0.0  ;;  %v702_v34 = vmax.f32 %v622_v60, 0.0  ;;  %v717_v26 = vld [vmem:[%s2298_s3 + $0x20] sm:$0xff] }
 0x100   :  { %v685_v35 = vmax.f32 %v537_v57, 0.0  ;;  %v701_v36 = vmax.f32 %v617_v32, 0.0  ;;  %v1484_v37 = vpop.f32.mrb[12].mxu0  ;;  %v1508_v38 = vpop.f32.mrb[12].mxu1  ;;  %1630 = vmatprep.subr.bf16.mxu0 %v1629_v59  ;;  %v720_v32 = vld [vmem:[%s2298_s3 + $0x38] sm:$0xff] }
 0x101   :  { %v552_v0 = vadd.f32 %v1484_v37, %v2100_v12  ;;  %v632_v62 = vadd.f32 %v1508_v38, %v2096_v2  ;;  %v546_v41 = vpop.f32.mrb[13].mxu0  ;;  %v626_v42 = vpop.f32.mrb[13].mxu1  ;;  %1632 = vmatpush3.bf16.msra.mxu0 %v1631_v31  ;;  %v716_v31 = vld [vmem:[%s2298_s3 + $0x18] sm:$0xff]  ;;  %v723_v37 = vld [vmem:[%s2298_s3 + $0x50] sm:$0xff] }
 0x102   :  { %v1635_v45 = vpack.c.bf16 %v686_v33, %v685_v35  ;;  %v1633_v46 = vpack.c.bf16 %v702_v34, %v701_v36  ;;  %v547_v63 = vadd.f32 %v546_v41, %v2098_v11  ;;  %v627_v61 = vadd.f32 %v626_v42, %v2094_v1  ;;  %v294_v60 = vpop.permute.xlu0 %293  ;;  %v719_v35 = vld [vmem:[%s2298_s3 + $0x30] sm:$0xff]  ;;  %v718_v41 = vld [vmem:[%s2298_s3 + $0x28] sm:$0xff]  ;;  %v725_v42 = vld [vmem:[%s2298_s3 + $0x60] sm:$0xff] }
 0x103   :  { %v688_v3 = vmax.f32 %v552_v0, 0.0  ;;  %v704_v4 = vmax.f32 %v632_v62, 0.0  ;;  %v715_v38 = vld [vmem:[%s2298_s3 + $0x10] sm:$0xff]  ;;  %v722_v0 = vld [vmem:[%s2298_s3 + $0x48] sm:$0xff] }
 0x104   :  { %v687_v52 = vmax.f32 %v547_v63, 0.0  ;;  %v703_v50 = vmax.f32 %v627_v61, 0.0  ;;  %v1487_v5 = vpop.f32.mrb[14].mxu0  ;;  %v1511_v6 = vpop.f32.mrb[14].mxu1  ;;  %1634 = vmatprep.subr.bf16.mxu0 %v1633_v46  ;;  %v726_v62 = vld [vmem:[%s2298_s3 + $0x68] sm:$0xff]  ;;  %v721_v46 = vld [vmem:[%s2298_s3 + $0x40] sm:$0xff] }
 0x105   :  { %v562_v12 = vadd.f32 %v1487_v5, %v189_v48  ;;  %v642_v2 = vadd.f32 %v1511_v6, %v269_v22  ;;  %v556_v7 = vpop.f32.mrb[15].mxu0  ;;  %v636_v51 = vpop.f32.mrb[15].mxu1  ;;  %1636 = vmatpush3.bf16.msra.mxu0 %v1635_v45  ;;  %v729_v45 = vld [vmem:[%s2298_s3 + $0x80] sm:$0xff]  ;;  %v728_v63 = vld [vmem:[%s2298_s3 + $0x78] sm:$0xff]  ;;  %v731_v48 = vld [vmem:[%s2298_s3 + $0x90] sm:$0xff] }
 0x106   :  { %v1639_v49 = vpack.c.bf16 %v688_v3, %v687_v52  ;;  %v1637_v8 = vpack.c.bf16 %v704_v4, %v703_v50  ;;  %v557_v9 = vadd.f32 %v556_v7, %v184_v47  ;;  %v637_v11 = vadd.f32 %v636_v51, %v264_v21  ;;  %v732_v61 = vld [vmem:[%s2298_s3 + $0x98] sm:$0xff]  ;;  %v735_v3 = vld [vmem:[%s2298_s3 + $0xb0] sm:$0xff]  ;;  %v734_v52 = vld [vmem:[%s2298_s3 + $0xa8] sm:$0xff] }
 0x107   :  { %v690_v10 = vmax.f32 %v562_v12, 0.0  ;;  %v706_v1 = vmax.f32 %v642_v2, 0.0  ;;  %v724_v47 = vld [vmem:[%s2298_s3 + $0x58] sm:$0xff]  ;;  %v727_v4 = vld [vmem:[%s2298_s3 + $0x70] sm:$0xff]  ;;  %v738_v50 = vld [vmem:[%s2298_s3 + $0xc8] sm:$0xff] }
 0x108   :  { %v689_v13 = vmax.f32 %v557_v9, 0.0  ;;  %v705_v14 = vmax.f32 %v637_v11, 0.0  ;;  %v1514_v15 = vpop.f32.mrb[16].mxu1  ;;  %1638 = vmatprep.subr.bf16.mxu0 %v1637_v8  ;;  %v730_v5 = vld [vmem:[%s2298_s3 + $0x88] sm:$0xff]  ;;  %v737_v6 = vld [vmem:[%s2298_s3 + $0xc0] sm:$0xff]  ;;  %v740_v7 = vld [vmem:[%s2298_s3 + $0xd8] sm:$0xff] }
 0x109   :  { %v652_v16 = vadd.f32 %v1514_v15, %v2104_v44  ;;  %v646_v56 = vpop.f32.mrb[17].mxu1  ;;  %1640 = vmatpush3.bf16.msra.mxu0 %v1639_v49  ;;  %v741_v12 = vld [vmem:[%s2298_s3 + $0xe0] sm:$0xff]  ;;  %v744_v51 = vld [vmem:[%s2298_s3 + $0xf8] sm:$0xff]  ;;  %v743_v8 = vld [vmem:[%s2298_s3 + $0xf0] sm:$0xff] }
 0x10a   :  { %v1643_v17 = vpack.c.bf16 %v690_v10, %v689_v13  ;;  %v1641_v18 = vpack.c.bf16 %v706_v1, %v705_v14  ;;  %v647_v19 = vadd.f32 %v646_v56, %v2102_v43  ;;  %v299_v43 = vpop.permute.xlu1 %298  ;;  %v733_v2 = vld [vmem:[%s2298_s3 + $0xa0] sm:$0xff]  ;;  %v736_v49 = vld [vmem:[%s2298_s3 + $0xb8] sm:$0xff]  ;;  %v747_v9 = vld [vmem:[%s2298_s3 + $0x110] sm:$0xff] }
 0x10b   :  { %v708_v55 = vmax.f32 %v652_v16, 0.0  ;;  %v739_v11 = vld [vmem:[%s2298_s3 + $0xd0] sm:$0xff]  ;;  %v746_v10 = vld [vmem:[%s2298_s3 + $0x108] sm:$0xff]  ;;  %v749_v14 = vld [vmem:[%s2298_s3 + $0x120] sm:$0xf] }
 0x10c   :  { %v707_v53 = vmax.f32 %v647_v19, 0.0  ;;  %v1517_v22 = vpop.f32.mrb[18].mxu1  ;;  %1642 = vmatprep.subr.bf16.mxu0 %v1641_v18  ;;  %v750_v1 = vld [vmem:[%s2298_s3 + $0x128] sm:$0xf]  ;;  %v745_v15 = vld [vmem:[%s2298_s3 + $0x100] sm:$0xff]  ;;  %v748_v16 = vld [vmem:[%s2298_s3 + $0x118] sm:$0xff] }
 0x10d   :  { %v662_v21 = vadd.f32 %v1517_v22, %v289_v54  ;;  %v656_v23 = vpop.f32.mrb[19].mxu1  ;;  %1644 = vmatpush3.bf16.msra.mxu0 %v1643_v17  ;;  %v742_v13 = vld [vmem:[%s2298_s3 + $0xe8] sm:$0xff]  ;;  %v751_v56 = vld [vmem:[%s2298_s3 + $0x130] sm:$0xf]  ;;  %v768_v22 = vpop.permute.xlu0 %767 }
 0x10e   :  { %v1646_v44 = vpack.c.bf16 %v708_v55, %v707_v53  ;;  %v657_v25 = vadd.f32 %v656_v23, %v284_v20 }
 0x10f   :  { %v710_v27 = vmax.f32 %v662_v21, 0.0 }
 0x110   :  { %v709_v28 = vmax.f32 %v657_v25, 0.0  ;;  %v1520_v58 = vpop.f32.mrb[20].mxu1  ;;  %939 = vmatmul.mubr.f32.vlgmr.msra.gmra.mrb[16].mxu0 %v713_v24  ;;  %1647 = vmatpush3.bf16.msra.mxu1 %v1646_v44 }
 0x111   :  { %v672_v29 = vadd.f32 %v1520_v58, %v299_v43  ;;  %v666_v30 = vpop.f32.mrb[21].mxu1  ;;  %943 = vmatprep.mubr.f32.mxu0 %v717_v26  ;;  %1648 = vmatprep.subr.bf16.mxu1 %v1693_v39  ;;  %v773_v43 = vpop.permute.xlu1 %772 }
 0x112   :  { %v1649_v59 = vpack.c.bf16 %v710_v27, %v709_v28  ;;  %v667_v57 = vadd.f32 %v666_v30, %v294_v60 }
 0x113   :  { %v712_v33 = vmax.f32 %v672_v29, 0.0 }
 0x114   :  { %v711_v34 = vmax.f32 %v667_v57, 0.0  ;;  %944 = vmatmul.mubr.f32.gmra.mrb[18].mxu0 %v716_v31  ;;  %1650 = vmatpush3.bf16.msra.mxu1 %v1649_v59  ;;  %v778_v57 = vpop.permute.xlu0 %777 }
 0x115   :  { %948 = vmatprep.mubr.f32.mxu0 %v720_v32  ;;  %1651 = vmatprep.subr.bf16.mxu1 %v1693_v39 }
 0x116   :  { %v1652_v36 = vpack.c.bf16 %v712_v33, %v711_v34 }
 0x118   :  { %949 = vmatmul.mubr.f32.gmra.mrb[20].mxu0 %v719_v35  ;;  %1654 = vmatpush3.bf16.msk.msra.mxu1 %vm1653_vm5, %v1652_v36 }
 0x119   :  { %953 = vmatprep.mubr.f32.mxu0 %v723_v37  ;;  %1655 = vmatprep.subr.bf16.mxu1 %v1693_v39 }
 0x11b   :  { %1534 = vmatmul.mubr.msk.f32.vlgmr.msra.gmra.mrb[22].mxu1 %vm830_vm6, %v715_v38 }
 0x11c   :  { %954 = vmatmul.mubr.f32.gmra.mrb[22].mxu0 %v722_v0  ;;  %1536 = vmatprep.mubr.msk.f32.mxu1 %vm1694_vm2, %v1695_v40 }
 0x11d   :  { %958 = vmatprep.mubr.f32.mxu0 %v726_v62 }
 0x11f   :  { %1537 = vmatmul.mubr.msk.f32.gmra.mrb[24].mxu1 %vm830_vm6, %v718_v41 }
 0x120   :  { %959 = vmatmul.mubr.f32.gmra.mrb[24].mxu0 %v725_v42  ;;  %1539 = vmatprep.mubr.msk.f32.mxu1 %vm1694_vm2, %v1695_v40  ;;  %v783_v42 = vpop.permute.xlu1 %782 }
 0x121   :  { %963 = vmatprep.mubr.f32.mxu0 %v729_v45 }
 0x123   :  { %1540 = vmatmul.mubr.msk.f32.gmra.mrb[26].mxu1 %vm830_vm6, %v721_v46 }
 0x124   :  { %964 = vmatmul.mubr.f32.gmra.mrb[26].mxu0 %v728_v63  ;;  %1542 = vmatprep.mubr.msk.f32.mxu1 %vm1694_vm2, %v1695_v40 }
 0x125   :  { %968 = vmatprep.mubr.f32.mxu0 %v732_v61 }
 0x127   :  { %1543 = vmatmul.mubr.msk.f32.gmra.mrb[28].mxu1 %vm830_vm6, %v724_v47 }
 0x128   :  { %969 = vmatmul.mubr.f32.gmra.mrb[28].mxu0 %v731_v48  ;;  %1545 = vmatprep.mubr.msk.f32.mxu1 %vm1694_vm2, %v1695_v40 }
 0x129   :  { %973 = vmatprep.mubr.f32.mxu0 %v735_v3 }
 0x12b   :  { %1546 = vmatmul.mubr.msk.f32.gmra.mrb[30].mxu1 %vm830_vm6, %v727_v4  ;;  %v788_v4 = vpop.permute.xlu0 %787 }
 0x12c   :  { %974 = vmatmul.mubr.f32.gmra.mrb[30].mxu0 %v734_v52  ;;  %1548 = vmatprep.mubr.msk.f32.mxu1 %vm1694_vm2, %v1695_v40 }
 0x12d   :  { %978 = vmatprep.mubr.f32.mxu0 %v738_v50 }
 0x12f   :  { %1549 = vmatmul.mubr.msk.f32.gmra.mrb[32].mxu1 %vm830_vm6, %v730_v5 }
 0x130   :  { %979 = vmatmul.mubr.f32.gmra.mrb[32].mxu0 %v737_v6  ;;  %1551 = vmatprep.mubr.msk.f32.mxu1 %vm1694_vm2, %v1695_v40 }
 0x131   :  { %983 = vmatprep.mubr.f32.mxu0 %v741_v12 }
 0x133   :  { %1552 = vmatmul.mubr.msk.f32.gmra.mrb[34].mxu1 %vm830_vm6, %v733_v2 }
 0x134   :  { %984 = vmatmul.mubr.f32.gmra.mrb[34].mxu0 %v740_v7  ;;  %1554 = vmatprep.mubr.msk.f32.mxu1 %vm1694_vm2, %v1695_v40 }
 0x135   :  { %988 = vmatprep.mubr.f32.mxu0 %v744_v51 }
 0x137   :  { %1555 = vmatmul.mubr.msk.f32.gmra.mrb[36].mxu1 %vm830_vm6, %v736_v49 }
 0x138   :  { %989 = vmatmul.mubr.f32.gmra.mrb[36].mxu0 %v743_v8  ;;  %1557 = vmatprep.mubr.msk.f32.mxu1 %vm1694_vm2, %v1695_v40 }
 0x139   :  { %993 = vmatprep.mubr.f32.mxu0 %v747_v9  ;;  %v793_v9 = vpop.permute.xlu1 %792 }
 0x13b   :  { %1558 = vmatmul.mubr.msk.f32.gmra.mrb[38].mxu1 %vm830_vm6, %v739_v11 }
 0x13c   :  { %994 = vmatmul.mubr.f32.gmra.mrb[38].mxu0 %v746_v10  ;;  %1560 = vmatprep.mubr.msk.f32.mxu1 %vm1694_vm2, %v1695_v40 }
 0x13d   :  { %998 = vmatprep.mubr.f32.mxu0 %v750_v1 }
 0x13f   :  { %1561 = vmatmul.mubr.msk.f32.gmra.mrb[40].mxu1 %vm830_vm6, %v742_v13 }
 0x140   :  { %999 = vmatmul.mubr.f32.gmra.mrb[40].mxu0 %v749_v14  ;;  %1563 = vmatprep.mubr.msk.f32.mxu1 %vm1694_vm2, %v1695_v40 }
 0x143   :  { %1564 = vmatmul.mubr.msk.f32.gmra.mrb[42].mxu1 %vm830_vm6, %v745_v15 }
 0x144   :  { %1566 = vmatprep.mubr.msk.f32.mxu1 %vm1694_vm2, %v1695_v40 }
 0x147   :  { %1567 = vmatmul.mubr.msk.f32.gmra.mrb[44].mxu1 %vm830_vm6, %v748_v16 }
 0x148   :  { %1569 = vmatprep.mubr.msk.f32.mxu1 %vm1694_vm2, %v1695_v40 }
 0x14b   :  { %1570 = vmatmul.mubr.msk.f32.gmra.mrb[46].mxu1 %vm830_vm6, %v751_v56  ;;  %v798_v56 = vpop.permute.xlu0 %797 }
 0x14c   :  { %1598 = vmatprep.mubr.msk.f32.mxu1 %vm1694_vm2, %v1695_v40 }
 0x1e3   :  { %v1378_v54 = vpop.f32.mrb[16].mxu0 }
 0x1e4   :  { %v1379_v17 = vpop.f32.mrb[17].mxu0 }
 0x1e5   :  { %v1380_v18 = vadd.f32 %v1379_v17, %v1378_v54 }
 0x1e7   :  { %v1381_v19 = vpop.f32.mrb[18].mxu0  ;;  %v941_v24 = vadd.f32 %v1380_v18, %v768_v22 }
 0x1e8   :  { %v1382_v20 = vpop.f32.mrb[19].mxu0 }
 0x1e9   :  { %v1383_v55 = vadd.f32 %v1382_v20, %v1381_v19 }
 0x1eb   :  { %v1384_v53 = vpop.f32.mrb[20].mxu0  ;;  %v946_v60 = vadd.f32 %v1383_v55, %v773_v43 }
 0x1ec   :  { %v1385_v21 = vpop.f32.mrb[21].mxu0 }
 0x1ed   :  { %v1386_v23 = vadd.f32 %v1385_v21, %v1384_v53 }
 0x1ee   :  { %v1070_v44 = vpop.f32.mrb[22].mxu1 }
 0x1ef   :  { %v1071_v25 = vadd.f32 %v1070_v44, %v941_v24  ;;  %v1387_v26 = vpop.f32.mrb[22].mxu0  ;;  %v1535_v27 = vpop.f32.mrb[23].mxu1  ;;  %v951_v36 = vadd.f32 %v1386_v23, %v778_v57 }
 0x1f0   :  { %v1388_v28 = vpop.f32.mrb[23].mxu0  ;;  %v803_v24 = vpop.permute.xlu1 %802 }
 0x1f1   :  { %v1389_v58 = vadd.f32 %v1388_v28, %v1387_v26  ;;  %v1134_v33 = vmax.f32 %v1071_v25, 0.0 }
 0x1f2   :  { %v1075_v29 = vpop.f32.mrb[24].mxu1 }
 0x1f3   :  { %v1076_v30 = vadd.f32 %v1075_v29, %v946_v60  ;;  %v1390_v31 = vpop.f32.mrb[24].mxu0  ;;  %v1538_v59 = vpop.f32.mrb[25].mxu1  ;;  %v956_v63 = vadd.f32 %v1389_v58, %v783_v42 }
 0x1f4   :  { %v1391_v32 = vpop.f32.mrb[25].mxu0  ;;  %v808_v60 = vpop.permute.xlu0 %807 }
 0x1f5   :  { %v1135_v34 = vmax.f32 %v1076_v30, 0.0  ;;  %v1392_v35 = vadd.f32 %v1391_v32, %v1390_v31 }
 0x1f6   :  { %v1080_v37 = vpop.f32.mrb[26].mxu1 }
 0x1f7   :  { %v1656_v38 = vpack.c.bf16 %v1135_v34, %v1134_v33  ;;  %v1081_v0 = vadd.f32 %v1080_v37, %v951_v36  ;;  %v1393_v62 = vpop.f32.mrb[26].mxu0  ;;  %v1541_v41 = vpop.f32.mrb[27].mxu1  ;;  %v961_v12 = vadd.f32 %v1392_v35, %v788_v4 }
 0x1f8   :  { %v1394_v45 = vpop.f32.mrb[27].mxu0  ;;  %v813_v37 = vpop.permute.xlu1 %812 }
 0x1f9   :  { %v1395_v46 = vadd.f32 %v1394_v45, %v1393_v62  ;;  %1657 = vmatpush3.bf16.msra.mxu1 %v1656_v38  ;;  %v1136_v50 = vmax.f32 %v1081_v0, 0.0 }
 0x1fa   :  { %v1085_v61 = vpop.f32.mrb[28].mxu1  ;;  %1658 = vmatprep.subr.bf16.mxu1 %v1693_v39 }
 0x1fb   :  { %v1086_v47 = vadd.f32 %v1085_v61, %v956_v63  ;;  %v1396_v48 = vpop.f32.mrb[28].mxu0  ;;  %v1544_v3 = vpop.f32.mrb[29].mxu1  ;;  %v966_v1 = vadd.f32 %v1395_v46, %v793_v9 }
 0x1fc   :  { %v1397_v52 = vpop.f32.mrb[29].mxu0  ;;  %v818_v63 = vpop.permute.xlu0 %817 }
 0x1fd   :  { %v1137_v5 = vmax.f32 %v1086_v47, 0.0  ;;  %v1398_v6 = vadd.f32 %v1397_v52, %v1396_v48 }
 0x1fe   :  { %v1090_v2 = vpop.f32.mrb[30].mxu1 }
 0x1ff   :  { %v1659_v7 = vpack.c.bf16 %v1137_v5, %v1136_v50  ;;  %v1091_v51 = vadd.f32 %v1090_v2, %v961_v12  ;;  %v1399_v49 = vpop.f32.mrb[30].mxu0  ;;  %v1547_v8 = vpop.f32.mrb[31].mxu1  ;;  %v971_v20 = vadd.f32 %v1398_v6, %v798_v56  ;;  %v1147_v56 = vld [vmem:[%s2299_s5] sm:$0x1] }
 0x200   :  { %v1400_v11 = vpop.f32.mrb[31].mxu0  ;;  %v823_v12 = vpop.permute.xlu1 %822 }
 0x201   :  { %v1401_v10 = vadd.f32 %v1400_v11, %v1399_v49  ;;  %1660 = vmatpush3.bf16.msra.mxu1 %v1659_v7  ;;  %v1138_v17 = vmax.f32 %v1091_v51, 0.0  ;;  %v828_v8 = vpop.permute.xlu0 %827 }
 0x202   :  { %v1095_v13 = vpop.f32.mrb[32].mxu1  ;;  %1661 = vmatprep.subr.bf16.mxu1 %v1693_v39 }
 0x203   :  { %v1096_v14 = vadd.f32 %v1095_v13, %v966_v1  ;;  %v1402_v15 = vpop.f32.mrb[32].mxu0  ;;  %v1550_v16 = vpop.f32.mrb[33].mxu1  ;;  %v976_v26 = vadd.f32 %v1401_v10, %v803_v24 }
 0x204   :  { %v1403_v54 = vpop.f32.mrb[33].mxu0 }
 0x205   :  { %v1139_v18 = vmax.f32 %v1096_v14, 0.0  ;;  %v1404_v19 = vadd.f32 %v1403_v54, %v1402_v15 }
 0x206   :  { %v1100_v55 = vpop.f32.mrb[34].mxu1 }
 0x207   :  { %v1662_v53 = vpack.c.bf16 %v1139_v18, %v1138_v17  ;;  %v1101_v22 = vadd.f32 %v1100_v55, %v971_v20  ;;  %v1405_v21 = vpop.f32.mrb[34].mxu0  ;;  %v1553_v23 = vpop.f32.mrb[35].mxu1  ;;  %v981_v57 = vadd.f32 %v1404_v19, %v808_v60 }
 0x208   :  { %v1406_v44 = vpop.f32.mrb[35].mxu0  ;;  %v1152_v18 = vpop.permute.xlu1 %1151 }
 0x209   :  { %v1407_v25 = vadd.f32 %v1406_v44, %v1405_v21  ;;  %1663 = vmatpush3.bf16.msra.mxu1 %v1662_v53  ;;  %v1140_v30 = vmax.f32 %v1101_v22, 0.0 }
 0x20a   :  { %v1105_v27 = vpop.f32.mrb[36].mxu1  ;;  %1664 = vmatprep.subr.bf16.mxu1 %v1693_v39 }
 0x20b   :  { %v1106_v43 = vadd.f32 %v1105_v27, %v976_v26  ;;  %v1408_v28 = vpop.f32.mrb[36].mxu0  ;;  %v1556_v58 = vpop.f32.mrb[37].mxu1  ;;  %v986_v62 = vadd.f32 %v1407_v25, %v813_v37 }
 0x20c   :  { %v1409_v29 = vpop.f32.mrb[37].mxu0 }
 0x20d   :  { %v1141_v31 = vmax.f32 %v1106_v43, 0.0  ;;  %v1410_v59 = vadd.f32 %v1409_v29, %v1408_v28 }
 0x20e   :  { %v1110_v32 = vpop.f32.mrb[38].mxu1 }
 0x20f   :  { %v1665_v33 = vpack.c.bf16 %v1141_v31, %v1140_v30  ;;  %v1111_v34 = vadd.f32 %v1110_v32, %v981_v57  ;;  %v1411_v35 = vpop.f32.mrb[38].mxu0  ;;  %v1559_v36 = vpop.f32.mrb[39].mxu1  ;;  %v991_v4 = vadd.f32 %v1410_v59, %v818_v63 }
 0x210   :  { %v1412_v38 = vpop.f32.mrb[39].mxu0 }
 0x211   :  { %v1413_v0 = vadd.f32 %v1412_v38, %v1411_v35  ;;  %1666 = vmatpush3.bf16.msra.mxu1 %v1665_v33  ;;  %v1142_v47 = vmax.f32 %v1111_v34, 0.0 }
 0x212   :  { %v1115_v41 = vpop.f32.mrb[40].mxu1  ;;  %1667 = vmatprep.subr.bf16.mxu1 %v1693_v39 }
 0x213   :  { %v1116_v42 = vadd.f32 %v1115_v41, %v986_v62  ;;  %v1414_v45 = vpop.f32.mrb[40].mxu0  ;;  %v1562_v46 = vpop.f32.mrb[41].mxu1  ;;  %v996_v2 = vadd.f32 %v1413_v0, %v823_v12 }
 0x214   :  { %v1415_v61 = vpop.f32.mrb[41].mxu0 }
 0x215   :  { %v1143_v48 = vmax.f32 %v1116_v42, 0.0  ;;  %v1416_v3 = vadd.f32 %v1415_v61, %v1414_v45 }
 0x216   :  { %v1120_v52 = vpop.f32.mrb[42].mxu1 }
 0x217   :  { %v1668_v50 = vpack.c.bf16 %v1143_v48, %v1142_v47  ;;  %v1121_v5 = vadd.f32 %v1120_v52, %v991_v4  ;;  %v1565_v6 = vpop.f32.mrb[43].mxu1  ;;  %v1001_v10 = vadd.f32 %v1416_v3, %v828_v8 }
 0x219   :  { %1669 = vmatpush3.bf16.msra.mxu1 %v1668_v50  ;;  %v1144_v9 = vmax.f32 %v1121_v5, 0.0 }
 0x21a   :  { %v1125_v7 = vpop.f32.mrb[44].mxu1  ;;  %1670 = vmatprep.subr.bf16.mxu1 %v1693_v39  ;;  %v1154_v39 = vlaneseq }
 0x21b   :  { %v1126_v51 = vadd.f32 %v1125_v7, %v996_v2  ;;  %v1568_v49 = vpop.f32.mrb[45].mxu1 }
 0x21c   :  { %v1155_v54 = vshrl.u32 %v1154_v39, 7 }
 0x21d   :  { %v1145_v11 = vmax.f32 %v1126_v51, 0.0 }
 0x21e   :  { %v1130_v1 = vpop.f32.mrb[46].mxu1  ;;  %v1156_v17 = vsub.s32 0, %v1155_v54 }
 0x21f   :  { %v1671_v13 = vpack.c.bf16 %v1145_v11, %v1144_v9  ;;  %v1131_v14 = vadd.f32 %v1130_v1, %v1001_v10  ;;  %v1571_v15 = vpop.f32.mrb[47].mxu1 }
 0x220   :  { %v1157_v19 = vrot.slane %v1152_v18, %v1156_v17 }
 0x221   :  { %1672 = vmatpush3.bf16.msra.mxu1 %v1671_v13  ;;  %v1146_v16 = vmax.f32 %v1131_v14, 0.0 }
 0x222   :  { %1596 = vmatprep.subr.mxu1 %v1695_v40 }
 0x225   :  { %1597 = vmatpush3.msk.msra.mxu1 %vm870_vm3, %v1146_v16 }
 0x226   :  { %1599 = vmatmul.mubr.msk.f32.vlgmr.msra.gmra.mrb[48].mxu1 %vm1158_vm7, %v1147_v56 }
 0x2f9   :  { %v1231_v20 = vpop.f32.mrb[48].mxu1 }
 0x2fa   :  { %v1232_v55 = vadd.f32 %v1231_v20, %v1157_v19  ;;  %v1600_v53 = vpop.f32.mrb[49].mxu1 }
 0x2fc   :  { %v1235_v22 = vsub.f32 0.0, %v1232_v55 }
 0x2fe   :  { %v1236_v21 = vmul.f32 1.442695, %v1235_v22 }
 0x300   :  { %1688 = vpow2.f32 %v1236_v21 }
 0x30a   :  { %v1689_v40 = vpop.eup %1688 }
 0x30b   :  { %v1238_v23 = vadd.f32 1.0, %v1689_v40 }
 0x30d   :  { %1690 = vrcp.f32 %v1238_v23 }
 0x317   :  { %v1691_v24 = vpop.eup %1690 }
 0x318   :  { %1241 = vst [vmem:[%s2300_s7] sm:$0x1] %v1691_v24 }

</bundles_post_ra>
